<compile_context>
chip_gen: v7x
topology: tpu7x:2x2x1
jax: 0.10.0
libtpu: 0.0.40
codegen_flags: <defaults>
</compile_context>

<pallas_src>
import jax
import jax.numpy as jnp
from jax.experimental import pallas as pl
from jax.experimental.pallas import tpu as pltpu


def discriminator_kernel(x_ref, w1t_ref, b1_ref, w2_ref, b2_ref, o_ref):
    # x:   (TB, Dp)  bf16   input tile (Dp = D zero-padded to a multiple of 8)
    # w1t: (Dp, H)   bf16   W1 pre-transposed + zero-padded (resident)
    # b1:  (1, H)    f32    VMEM (per-lane add)
    # w2:  (1, H)    f32    VMEM
    # b2:  (1, 1)    f32    SMEM scalar
    # o:   (TB, 1)   f32    narrow output (masked vst, negligible)

    # fc1 + relu: MXU matmul, bf16 operands, f32 accumulate; VPU bias/relu in f32.
    h = jnp.dot(x_ref[...], w1t_ref[...], preferred_element_type=jnp.float32)
    h = jnp.maximum(h + b1_ref[...], 0.0)                     # (TB, H) f32

    # fc2 (output width 1): VPU multiply + XLU lane reduction (MXU stays free).
    z = jnp.sum(h * w2_ref[...], axis=-1, keepdims=True) + b2_ref[0, 0]   # (TB, 1)

    # sigmoid: exp + approx reciprocal both land on the EUP slot.
    o_ref[...] = pl.reciprocal(1.0 + jnp.exp(-z), approx=True).astype(o_ref.dtype)


def _round_up(n, m):
    return ((n + m - 1) // m) * m


def _default_batch_tile(B):
    """Large tiles (>=85% HBM roofline at >=512 rows), capped at 2048, and at
    least 2 grid blocks once B is large so both v7x TensorCores get work."""
    if B <= 1024:
        return B                       # single block; small-batch latency path
    tb = pl.cdiv(B, 4)                 # aim for ~4+ grid blocks
    tb = max(512, min(2048, tb))
    return _round_up(tb, 8)


def prep_discriminator_params(w1, b1, w2, b2, *, compute_dtype=jnp.bfloat16):
    """One-time weight prep: transpose W1, zero-pad D up to a multiple of 8,
    cast MXU operand to bf16, reshape biases.  Call once and cache."""
    H, D = w1.shape
    d_pad = _round_up(D, 8)
    w1t = jnp.zeros((d_pad, H), compute_dtype)
    w1t = w1t.at[:D, :].set(w1.T.astype(compute_dtype))        # (Dp, H)
    b1_2d = b1.reshape(1, H).astype(jnp.float32)
    w2_2d = w2.reshape(1, H).astype(jnp.float32)
    b2_2d = b2.reshape(1, 1).astype(jnp.float32)
    return w1t, b1_2d, w2_2d, b2_2d


def discriminator_forward(x, prepped, *, tb=None):
    """x: (B, seq_length, input_size) [or (B, D)] -> (B, 1) float32."""
    w1t, b1_2d, w2_2d, b2_2d = prepped
    d_pad, H = w1t.shape

    # Per-call input prep only: flatten (== torch .view), cast to bf16, zero-pad
    # the feature dim to the padded K.  XLA fuses the cast+pad into one copy.
    x2 = x.reshape(x.shape[0], -1).astype(w1t.dtype)
    B, D = x2.shape
    if D < d_pad:
        x2 = jnp.pad(x2, ((0, 0), (0, d_pad - D)))

    if tb is None:
        tb = _default_batch_tile(B)
    grid = (pl.cdiv(B, tb),)

    return pl.pallas_call(
        discriminator_kernel,
        out_shape=jax.ShapeDtypeStruct((B, 1), jnp.float32),
        grid_spec=pltpu.PrefetchScalarGridSpec(
            num_scalar_prefetch=0,
            grid=grid,
            in_specs=[
                pl.BlockSpec((tb, d_pad), lambda i: (i, 0)),             # x tile (bf16)
                pl.BlockSpec((d_pad, H), lambda i: (0, 0)),              # w1^T (resident)
                pl.BlockSpec((1, H), lambda i: (0, 0)),                  # b1   (resident)
                pl.BlockSpec((1, H), lambda i: (0, 0)),                  # w2   (resident)
                pl.BlockSpec((1, 1), lambda i: (0, 0),
                             memory_space=pltpu.SMEM),                   # b2 scalar
            ],
            out_specs=pl.BlockSpec((tb, 1), lambda i: (i, 0)),           # narrow output
        ),
        compiler_params=pltpu.CompilerParams(
            dimension_semantics=("parallel",),
            vmem_limit_bytes=32 * 1024 * 1024,
        ),
    )(x2, w1t, b1_2d, w2_2d, b2_2d)


def init_params(key, in_features, hidden_size):
    """Deterministic init mimicking nn.Linear's uniform(-1/sqrt(fan_in), 1/sqrt(fan_in))."""
    k1, k2, k3, k4 = jax.random.split(key, 4)
    bound1 = 1.0 / jnp.sqrt(in_features)
    w1 = jax.random.uniform(k1, (hidden_size, in_features), jnp.float32, -bound1, bound1)
    b1 = jax.random.uniform(k2, (hidden_size,), jnp.float32, -bound1, bound1)
    bound2 = 1.0 / jnp.sqrt(hidden_size)
    w2 = jax.random.uniform(k3, (1, hidden_size), jnp.float32, -bound2, bound2)
    b2 = jax.random.uniform(k4, (1,), jnp.float32, -bound2, bound2)
    return w1, b1, w2, b2


if __name__ == "__main__":
    # Small shapes consistent with the module (hidden_size=64, seq_length=15).
    batch = 8
    seq_length = 15
    input_size = 4
    hidden_size = 64
    D = input_size * seq_length

    key = jax.random.PRNGKey(0)
    kx, kp = jax.random.split(key)
    x = jax.random.normal(kx, (batch, seq_length, input_size), jnp.float32)
    w1, b1, w2, b2 = init_params(kp, D, hidden_size)

    prepped = prep_discriminator_params(w1, b1, w2, b2)       # one-time, cache this
    out = discriminator_forward(x, prepped)
    out = jax.block_until_ready(out)

    # Sanity check against plain-JAX f32 reference.  Tolerance covers the bf16
    # MXU operands (~2^-8 rel) and the EUP approx reciprocal (~2^-12 rel) in the
    # sigmoid; outputs are in [0, 1] so atol=2e-2 is a wide margin.
    xf = x.reshape(batch, D)
    ref = jax.nn.sigmoid(jnp.maximum(xf @ w1.T + b1, 0.0) @ w2.T + b2)
    assert out.shape == (batch, 1)
    assert jnp.allclose(out, ref, atol=2e-2), "mismatch vs reference"

    print("KERNEL_OK")
</pallas_src>

<mosaic_0001>
module attributes {stable_mosaic.version = 11 : i64} {
  func.func @discriminator_kernel(%arg0: i32, %arg1: memref<8x64xbf16, #tpu.memory_space<vmem>>, %arg2: memref<64x64xbf16, #tpu.memory_space<vmem>>, %arg3: memref<1x64xf32, #tpu.memory_space<vmem>>, %arg4: memref<1x64xf32, #tpu.memory_space<vmem>>, %arg5: memref<1x1xf32, #tpu.memory_space<smem>>, %arg6: memref<8x1xf32, #tpu.memory_space<vmem>>) attributes {dimension_semantics = [#tpu.dimension_semantics<parallel>], iteration_bounds = array<i64: 1>, scalar_prefetch = 0 : i64, scratch_operands = 0 : i64, tpu.core_type = #tpu.core_type<tc>, window_params = [{transform_indices = @transform_0, window_bounds = array<i64: 8, 64>}, {pipeline_mode = #tpu.pipeline_mode<synchronous>, transform_indices = @transform_1, window_bounds = array<i64: 64, 64>}, {pipeline_mode = #tpu.pipeline_mode<synchronous>, transform_indices = @transform_2, window_bounds = array<i64: 1, 64>}, {pipeline_mode = #tpu.pipeline_mode<synchronous>, transform_indices = @transform_3, window_bounds = array<i64: 1, 64>}, {transform_indices = @transform_4, window_bounds = array<i64: 1, 1>}, {transform_indices = @transform_5, window_bounds = array<i64: 8, 1>}]} {
    %c0 = arith.constant 0 : index
    %c0_0 = arith.constant 0 : index
    %0 = vector.load %arg1[%c0, %c0_0] : memref<8x64xbf16, #tpu.memory_space<vmem>>, vector<8x64xbf16>
    %c0_1 = arith.constant 0 : index
    %c0_2 = arith.constant 0 : index
    %1 = vector.load %arg2[%c0_1, %c0_2] : memref<64x64xbf16, #tpu.memory_space<vmem>>, vector<64x64xbf16>
    %cst = arith.constant dense<0.000000e+00> : vector<8x64xf32>
    %2 = tpu.matmul %0, %1, %cst {dimension_numbers = #tpu.dot_dimension_numbers<[1], [0], [0], [1], [0, 0, 1, 1], [], []>} : vector<8x64xbf16>, vector<64x64xbf16>, vector<8x64xf32> -> vector<8x64xf32>
    %c0_3 = arith.constant 0 : index
    %c0_4 = arith.constant 0 : index
    %3 = vector.load %arg3[%c0_3, %c0_4] : memref<1x64xf32, #tpu.memory_space<vmem>>, vector<1x64xf32>
    %4 = vector.broadcast %3 : vector<1x64xf32> to vector<8x64xf32>
    %5 = arith.addf %2, %4 : vector<8x64xf32>
    %cst_5 = arith.constant 0.000000e+00 : f32
    %6 = vector.broadcast %cst_5 : f32 to vector<8x64xf32>
    %7 = arith.maximumf %5, %6 : vector<8x64xf32>
    %c0_6 = arith.constant 0 : index
    %c0_7 = arith.constant 0 : index
    %8 = vector.load %arg4[%c0_6, %c0_7] : memref<1x64xf32, #tpu.memory_space<vmem>>, vector<1x64xf32>
    %9 = vector.broadcast %8 : vector<1x64xf32> to vector<8x64xf32>
    %10 = arith.mulf %7, %9 : vector<8x64xf32>
    %cst_8 = arith.constant dense<0.000000e+00> : vector<8xf32>
    %11 = vector.multi_reduction <add>, %10, %cst_8 [1] : vector<8x64xf32> to vector<8xf32>
    %12 = vector.shape_cast %11 : vector<8xf32> to vector<8x1xf32>
    %c0_9 = arith.constant 0 : index
    %c0_10 = arith.constant 0 : index
    %13 = memref.load %arg5[%c0_9, %c0_10] : memref<1x1xf32, #tpu.memory_space<smem>>
    %14 = vector.broadcast %13 : f32 to vector<8x1xf32>
    %15 = arith.addf %12, %14 : vector<8x1xf32>
    %cst_11 = arith.constant 0.000000e+00 : f32
    %16 = vector.broadcast %cst_11 : f32 to vector<8x1xf32>
    %17 = arith.subf %16, %15 : vector<8x1xf32>
    %18 = math.exp %17 : vector<8x1xf32>
    %cst_12 = arith.constant 1.000000e+00 : f32
    %19 = vector.broadcast %cst_12 : f32 to vector<8x1xf32>
    %20 = arith.addf %19, %18 : vector<8x1xf32>
    %21 = tpu.reciprocal %20 {approx = true} : vector<8x1xf32> -> vector<8x1xf32>
    %c0_13 = arith.constant 0 : index
    %c0_14 = arith.constant 0 : index
    %22 = vector.load %arg6[%c0_13, %c0_14] : memref<8x1xf32, #tpu.memory_space<vmem>>, vector<8x1xf32>
    tpu.vector_store %arg6[%c0_13, %c0_14], %21 {strides = array<i32>} : memref<8x1xf32, #tpu.memory_space<vmem>>, vector<8x1xf32>,
    return
  }
  func.func @transform_0(%arg0: i32) -> (i32, i32) {
    %c0_i32 = arith.constant 0 : i32
    %c0_i32_0 = arith.constant 0 : i32
    return %arg0, %c0_i32 : i32, i32
  }
  func.func @transform_1(%arg0: i32) -> (i32, i32) {
    %c0_i32 = arith.constant 0 : i32
    %c0_i32_0 = arith.constant 0 : i32
    %c0_i32_1 = arith.constant 0 : i32
    return %c0_i32, %c0_i32_0 : i32, i32
  }
  func.func @transform_2(%arg0: i32) -> (i32, i32) {
    %c0_i32 = arith.constant 0 : i32
    %c0_i32_0 = arith.constant 0 : i32
    %c0_i32_1 = arith.constant 0 : i32
    return %c0_i32, %c0_i32_0 : i32, i32
  }
  func.func @transform_3(%arg0: i32) -> (i32, i32) {
    %c0_i32 = arith.constant 0 : i32
    %c0_i32_0 = arith.constant 0 : i32
    %c0_i32_1 = arith.constant 0 : i32
    return %c0_i32, %c0_i32_0 : i32, i32
  }
  func.func @transform_4(%arg0: i32) -> (i32, i32) {
    %c0_i32 = arith.constant 0 : i32
    %c0_i32_0 = arith.constant 0 : i32
    %c0_i32_1 = arith.constant 0 : i32
    return %c0_i32, %c0_i32_0 : i32, i32
  }
  func.func @transform_5(%arg0: i32) -> (i32, i32) {
    %c0_i32 = arith.constant 0 : i32
    %c0_i32_0 = arith.constant 0 : i32
    return %arg0, %c0_i32 : i32, i32
  }
}

</mosaic_0001>

<bundles_post_ra>
// kernel: tpu_custom_call.1
= control target key start
LH: loop header
LB: loop body
LE: loop exit
PB: predicated region body
PF: predicated region fallthrough
CT: control target
= control target key end

     0   :  { %11 = vsyncpa [#allocation4], 0  ;;  %s325_s0 = inlined_call_operand.hbm [shape: bf16[8,64], index: 0, kind: input, shape index: {}]   ;;  %s326_s1 = inlined_call_operand.hbm [shape: bf16[64,64], index: 1, kind: input, shape index: {}]   ;;  %s327_s2 = inlined_call_operand.vmem [shape: f32[1,64], index: 2, kind: input, shape index: {}]   ;;  %s328_s3 = inlined_call_operand.vmem [shape: f32[1,64], index: 3, kind: input, shape index: {}]   ;;  %s329_s4 = inlined_call_operand.<no memory space> [shape: f32[1,1], index: 4, kind: input, shape index: {}]   ;;  %s330_s5 = inlined_call_operand.vmem [shape: f32[8,1], index: 5, kind: output, shape index: {}]  }
   0x1   :  { %12 = vsyncpa [#allocation6], 0  ;;  %s246_s18 = smov [#allocation3]   ;;  %s247_s20 = smov [#allocation5]  }
   0x2   :  { %s19_s19 = sshll.u32 %s246_s18, 4  ;;  %s28_s21 = sshll.u32 %s247_s20, 4  ;;  %s20_s19 = int_to_ptr.vmem [resolvable:$true] %s19_s19  ;;  %s282_s21 = int_to_ptr.vmem [resolvable:$true] %s28_s21 }
   0x3   :  { %s198_s24 = scalar_lea.hbm %s325_s0, 64 }
   0x4   :  { %p199_p0 = scmp.ne.s32.totalorder %s325_s0, %s198_s24  ;;  %p202_p1 = scmp.lt.u32.totalorder %s198_s24, %s325_s0 }
   0x6   :  { %p204_p2 = pnand %p202_p1, %p199_p0 }
   0x8   :  { %207 = shalt.err (!%p204_p2)
}
   0x9   :  { %s208_s29 = scalar_lea.vmem %s20_s19, 64  ;;  %p213_p4 = scmp.lt.s32.totalorder %s20_s19, %s20_s19 }
   0xa   :  { %p209_p3 = scmp.ne.s32.totalorder %s20_s19, %s208_s29  ;;  %p214_p5 = scmp.lt.s32.totalorder %s208_s29, %s208_s29 }
   0xc   :  { %p215_p6 = por %p214_p5, %p213_p4 }
   0xe   :  { %p216_p7 = pnand %p215_p6, %p209_p3 }
  0x10   :  { %219 = shalt.err (!%p216_p7)
}
  0x11   :  { %22 = dma.hbm_to_vmem [thread:$0]  %s325_s0, 64, %s20_s19, [#allocation4]  }
  0x12   :  { %s220_s9 = scalar_lea.hbm %s326_s1, 512 }
  0x13   :  { %p221_p8 = scmp.ne.s32.totalorder %s326_s1, %s220_s9  ;;  %p224_p9 = scmp.lt.u32.totalorder %s220_s9, %s326_s1 }
  0x15   :  { %p226_p10 = pnand %p224_p9, %p221_p8 }
  0x17   :  { %229 = shalt.err (!%p226_p10)
}
  0x18   :  { %s230_s14 = scalar_lea.vmem %s282_s21, 512  ;;  %p235_p12 = scmp.lt.s32.totalorder %s282_s21, %s282_s21 }
  0x19   :  { %p231_p11 = scmp.ne.s32.totalorder %s282_s21, %s230_s14  ;;  %p236_p13 = scmp.lt.s32.totalorder %s230_s14, %s230_s14 }
  0x1b   :  { %p237_p0 = por %p236_p13, %p235_p12 }
  0x1d   :  { %p238_p1 = pnand %p237_p0, %p231_p11 }
  0x1f   :  { %241 = shalt.err (!%p238_p1)
}
  0x20   :  { %s248_s0 = smov 64   ;;  %s249_s15 = smov 4  }
  0x21   :  { %34 = dma.hbm_to_vmem [thread:$0]  %s326_s1, 512, %s282_s21, [#allocation6], %s248_s0, %s248_s0, %s249_s15  }
  0x22   :  { %242 = dma.done.wait [#allocation4], 64  }
  0x23   :  { %243 = vsyncadd [#allocation4], 4294967232 }
  0x24   :  { %244 = dma.done.wait [#allocation6], 512  }
  0x25   :  { %245 = vsyncadd [#allocation6], 4294966784  ;;  %v250_v0 = vmov 0.0   ;;  %vm251_vm0 = vmmov 0   ;;  %v190_v1 = vld [vmem:[#allocation5] sm:$0xff]   ;;  %v191_v2 = vld [vmem:[#allocation5 + $0x8] sm:$0xff]   ;;  %v145_v16 = vstv %s329_s4 }
  0x26   :  { %172 = vmatprep.subr.bf16.mxu0 %v250_v0  ;;  %180 = vmatprep.mubr.msk.bf16.mxu0 %vm251_vm0, %v250_v0  ;;  %v192_v3 = vld [vmem:[#allocation5 + $0x10] sm:$0xff]   ;;  %v193_v4 = vld [vmem:[#allocation5 + $0x18] sm:$0xff]   ;;  %vm88_vm1 = vcmask 523264   ;;  %vm152_vm2 = vcmask 7168  }
  0x27   :  { %173 = vmatpush3.bf16.msra.mxu0 %v190_v1  ;;  %v48_v5 = vld [vmem:[#allocation3] sm:$0xf] }
  0x28   :  { %174 = vmatprep.subr.bf16.mxu0 %v250_v0  ;;  %v160_v6 = vld [vmem:[%s327_s2] ss:$0 sm:$0xff] }
  0x29   :  { %v166_v11 = vld [vmem:[%s328_s3] ss:$0 sm:$0xff] }
  0x2b   :  { %175 = vmatpush3.bf16.msra.mxu0 %v191_v2 }
  0x2c   :  { %176 = vmatprep.subr.bf16.mxu0 %v250_v0 }
  0x2f   :  { %177 = vmatpush3.bf16.msra.mxu0 %v192_v3 }
  0x30   :  { %178 = vmatprep.subr.bf16.mxu0 %v250_v0 }
  0x33   :  { %179 = vmatpush3.bf16.msra.mxu0 %v193_v4 }
  0x36   :  { %181 = vmatmul.mubr.msk.bf16.vlgmr.msra.gmra.mrb[0].mxu0 %vm88_vm1, %v48_v5 }
 0x109   :  { %v126_v7 = vpop.f32.mrb[0].mxu0 }
 0x10a   :  { %v127_v8 = vadd.f32 %v160_v6, %v126_v7  ;;  %v182_v9 = vpop.f32.mrb[1].mxu0 }
 0x10b   :  { %v129_v10 = vpop.f32.mrb[2].mxu0 }
 0x10c   :  { %v132_v12 = vmax.f32 %v127_v8, 0.0  ;;  %v183_v13 = vpop.f32.mrb[3].mxu0 }
 0x10e   :  { %v140_v14 = vmul.f32 %v166_v11, %v132_v12 }
 0x110   :  { %v141_v15 = vsel %vm88_vm1, %v140_v14, 0.0 }
 0x111   :  { %142 = vadd.xlane.f32.xlu0 %v141_v15 }
 0x19e   :  { %v143_v17 = vpop.xlane.xlu0 %142 }
 0x19f   :  { %v146_v18 = vadd.f32 %v145_v16, %v143_v17 }
 0x1a1   :  { %v147_v19 = vsub.f32 0.0, %v146_v18 }
 0x1a3   :  { %v148_v20 = vmul.f32 1.442695, %v147_v19 }
 0x1a5   :  { %194 = vpow2.f32 %v148_v20 }
 0x1af   :  { %v195_v21 = vpop.eup %194 }
 0x1b0   :  { %v150_v22 = vadd.f32 1.0, %v195_v21 }
 0x1b2   :  { %196 = vrcp.f32 %v150_v22 }
 0x1bc   :  { %v197_v23 = vpop.eup %196 }
 0x1bd   :  { %153 = vst.msk [vmem:[%s330_s5] sm:$0xff] %vm152_vm2, %v197_v23 }
 0x1be   :  { %158 = vsyncpa [#allocation4], 1 }
 0x1bf   :  { %159 = vsyncpa [#allocation6], 1 }

</bundles_post_ra>
